<compile_context>
chip_gen: v5e
topology: v5e:2x2
jax: 0.10.0
libtpu: 0.0.40
codegen_flags: <defaults>
</compile_context>

<pallas_src>
import jax
import jax.numpy as jnp
from jax.experimental import pallas as pl
from jax.experimental.pallas import tpu as pltpu


def _tigre_kernel(x_ref, wseq_ref, bseq_ref, wq_ref, wk_ref, wv_ref,
                  wp_seq_ref, wp_rel_ref, bp_ref, out_ref):
    Bt, S, WF = x_ref.shape
    H = wseq_ref.shape[1]
    mm_dtype = wq_ref.dtype

    # --- SequentialEmbedding: one matmul over the whole batch tile -----------
    # (Bt, S, WF) -> (Bt*S, WF): lane dim unchanged, free reshape.
    x2 = x_ref[...].reshape(Bt * S, WF)
    e = jnp.tanh(
        jnp.dot(x2, wseq_ref[...], preferred_element_type=jnp.float32)
        + bseq_ref[...].astype(jnp.float32))                     # (Bt*S, H) f32

    # --- RelationalEmbedding: attention across the stock axis, per sample ----
    e_m = e.astype(mm_dtype)
    q = jnp.dot(e_m, wq_ref[...], preferred_element_type=jnp.float32)
    k = jnp.dot(e_m, wk_ref[...], preferred_element_type=jnp.float32)
    v = jnp.dot(e_m, wv_ref[...], preferred_element_type=jnp.float32)
    q3 = q.reshape(Bt, S, H)
    k3 = k.reshape(Bt, S, H)
    v3 = v.reshape(Bt, S, H)

    # Batched q @ k^T with the contraction on the last dims of both operands
    # (no explicit transpose / XLU pass).
    scores = jnp.einsum("bsh,bth->bst", q3, k3,
                        preferred_element_type=jnp.float32)      # (Bt, S, S)
    scores = scores * (1.0 / jnp.sqrt(jnp.float32(H)))
    scores = scores - jnp.max(scores, axis=-1, keepdims=True)
    p = jnp.exp(scores)
    inv_den = pl.reciprocal(jnp.sum(p, axis=-1, keepdims=True), approx=True)
    attn = p * inv_den                                           # (Bt, S, S)
    rel = jnp.tanh(
        jnp.einsum("bst,bth->bsh",
                   attn.astype(mm_dtype), v3.astype(mm_dtype),
                   preferred_element_type=jnp.float32))          # (Bt, S, H)

    # --- Prediction: fused [seq ; rel] linear as broadcast-mul + lane reduce --
    e3 = e.reshape(Bt, S, H)
    wps = wp_seq_ref[...].reshape(1, 1, H).astype(jnp.float32)
    wpr = wp_rel_ref[...].reshape(1, 1, H).astype(jnp.float32)
    pred = jnp.sum(e3 * wps + rel * wpr, axis=-1)                # (Bt, S)
    out_ref[...] = (pred + bp_ref[...]).astype(out_ref.dtype)


def tigre_forward(x, params, *, matmul_dtype=jnp.float32, batch_tile=8):
    """x: (B, W, S, F) — batch of (#window, #stocks, #features) windows.

    matmul_dtype: use jnp.bfloat16 on v6e/v7x at real sizes (f32 accumulation
    is kept via preferred_element_type); f32 default keeps bit-tight accuracy.
    """
    B, W, S, F = x.shape
    H = params["w_seq"].shape[1]
    WF = W * F

    # glue: bring stocks forward and flatten the temporal axis
    x_flat = jnp.transpose(x, (0, 2, 1, 3)).reshape(B, S, WF).astype(matmul_dtype)

    # Batch tile: largest divisor of B not exceeding `batch_tile`.
    Bt = min(B, batch_tile)
    while B % Bt:
        Bt -= 1

    w_seq = params["w_seq"].astype(matmul_dtype)
    b_seq = params["b_seq"].astype(jnp.float32)
    wq = params["w_q"].astype(matmul_dtype)
    wk = params["w_k"].astype(matmul_dtype)
    wv = params["w_v"].astype(matmul_dtype)
    # Prediction weights are used as broadcast rows (1, H), not matmul operands.
    wp_seq = params["w_pred_seq"].reshape(1, H).astype(jnp.float32)
    wp_rel = params["w_pred_rel"].reshape(1, H).astype(jnp.float32)
    b_pred = params["b_pred"].reshape(1, 1).astype(jnp.float32)

    out = pl.pallas_call(
        _tigre_kernel,
        out_shape=jax.ShapeDtypeStruct((B, S), jnp.float32),
        grid_spec=pltpu.PrefetchScalarGridSpec(
            num_scalar_prefetch=0,
            grid=(B // Bt,),
            in_specs=[
                pl.BlockSpec((Bt, S, WF), lambda b: (b, 0, 0)),
                pl.BlockSpec((WF, H), lambda b: (0, 0)),
                pl.BlockSpec((1, H), lambda b: (0, 0)),
                pl.BlockSpec((H, H), lambda b: (0, 0)),
                pl.BlockSpec((H, H), lambda b: (0, 0)),
                pl.BlockSpec((H, H), lambda b: (0, 0)),
                pl.BlockSpec((1, H), lambda b: (0, 0)),
                pl.BlockSpec((1, H), lambda b: (0, 0)),
                pl.BlockSpec((1, 1), lambda b: (0, 0)),
            ],
            out_specs=pl.BlockSpec((Bt, S), lambda b: (b, 0)),
        ),
        compiler_params=pltpu.CompilerParams(
            dimension_semantics=("parallel",),
            # Explicit, conservative scoped-VMEM budget: fits the v7x 64 MiB
            # per-TC envelope; the per-tile working set here is << 1 MiB.
            vmem_limit_bytes=32 * 1024 * 1024,
        ),
    )(x_flat, w_seq, b_seq, wq, wk, wv, wp_seq, wp_rel, b_pred)

    # TIGRE_Wrapper: predictions.squeeze(dim=-1) — already emitted as (B, S).
    return out


def _reference_forward(x, params):
    """Pure-JAX reference of the same dataflow (for correctness check)."""
    B, W, S, F = x.shape
    x_flat = jnp.transpose(x, (0, 2, 1, 3)).reshape(B, S, W * F).astype(jnp.float32)
    e = jnp.tanh(x_flat @ params["w_seq"] + params["b_seq"])
    q = e @ params["w_q"]
    k = e @ params["w_k"]
    v = e @ params["w_v"]
    scores = jnp.einsum("bsh,bth->bst", q, k) / jnp.sqrt(jnp.float32(e.shape[-1]))
    attn = jax.nn.softmax(scores, axis=-1)
    rel = jnp.tanh(jnp.einsum("bst,bth->bsh", attn, v))
    pred = e @ params["w_pred_seq"] + rel @ params["w_pred_rel"] + params["b_pred"]
    return pred[..., 0]


def make_params(key, W, F, H):
    # NOTE: at real model sizes pick H as a multiple of 128 (lane width) and
    # keep Bt*S a multiple of 8 (sublanes) for full vreg/MXU utilization.
    WF = W * F
    ks = jax.random.split(key, 7)
    scale = lambda fan_in: 1.0 / jnp.sqrt(jnp.float32(fan_in))
    return {
        "w_seq": jax.random.normal(ks[0], (WF, H), jnp.float32) * scale(WF),
        "b_seq": jnp.zeros((1, H), jnp.float32),
        "w_q": jax.random.normal(ks[1], (H, H), jnp.float32) * scale(H),
        "w_k": jax.random.normal(ks[2], (H, H), jnp.float32) * scale(H),
        "w_v": jax.random.normal(ks[3], (H, H), jnp.float32) * scale(H),
        "w_pred_seq": jax.random.normal(ks[4], (H, 1), jnp.float32) * scale(H),
        "w_pred_rel": jax.random.normal(ks[5], (H, 1), jnp.float32) * scale(H),
        "b_pred": jnp.zeros((1, 1), jnp.float32),
    }


if __name__ == "__main__":
    # TIGRE input: (#window size, #stocks, #features per stock), batched.
    B, W, S, F, H = 2, 8, 16, 4, 32
    key = jax.random.PRNGKey(0)
    k_x, k_p = jax.random.split(key)
    x = jax.random.normal(k_x, (B, W, S, F), jnp.float32)
    params = make_params(k_p, W, F, H)

    out = jax.block_until_ready(tigre_forward(x, params))
    ref = jax.block_until_ready(_reference_forward(x, params))

    assert out.shape == (B, S)
    # Tolerance allows for the approximate EUP reciprocal in the softmax.
    assert jnp.allclose(out, ref, atol=2e-3, rtol=2e-3)
    # TODO(synk): fit/save/load (training loop, checkpoint I/O) are host-side
    # logic with no kernel equivalent; only the forward pass is implemented.
    print("KERNEL_OK")
</pallas_src>

<mosaic_0001>
module attributes {stable_mosaic.version = 11 : i64} {
  func.func @_tigre_kernel(%arg0: i32, %arg1: memref<2x16x32xf32, #tpu.memory_space<vmem>>, %arg2: memref<32x32xf32, #tpu.memory_space<vmem>>, %arg3: memref<1x32xf32, #tpu.memory_space<vmem>>, %arg4: memref<32x32xf32, #tpu.memory_space<vmem>>, %arg5: memref<32x32xf32, #tpu.memory_space<vmem>>, %arg6: memref<32x32xf32, #tpu.memory_space<vmem>>, %arg7: memref<1x32xf32, #tpu.memory_space<vmem>>, %arg8: memref<1x32xf32, #tpu.memory_space<vmem>>, %arg9: memref<1x1xf32, #tpu.memory_space<vmem>>, %arg10: memref<2x16xf32, #tpu.memory_space<vmem>>) attributes {dimension_semantics = [#tpu.dimension_semantics<parallel>], iteration_bounds = array<i64: 1>, scalar_prefetch = 0 : i64, scratch_operands = 0 : i64, tpu.core_type = #tpu.core_type<tc>, window_params = [{transform_indices = @transform_0, window_bounds = array<i64: 2, 16, 32>}, {pipeline_mode = #tpu.pipeline_mode<synchronous>, transform_indices = @transform_1, window_bounds = array<i64: 32, 32>}, {pipeline_mode = #tpu.pipeline_mode<synchronous>, transform_indices = @transform_2, window_bounds = array<i64: 1, 32>}, {pipeline_mode = #tpu.pipeline_mode<synchronous>, transform_indices = @transform_3, window_bounds = array<i64: 32, 32>}, {pipeline_mode = #tpu.pipeline_mode<synchronous>, transform_indices = @transform_4, window_bounds = array<i64: 32, 32>}, {pipeline_mode = #tpu.pipeline_mode<synchronous>, transform_indices = @transform_5, window_bounds = array<i64: 32, 32>}, {pipeline_mode = #tpu.pipeline_mode<synchronous>, transform_indices = @transform_6, window_bounds = array<i64: 1, 32>}, {pipeline_mode = #tpu.pipeline_mode<synchronous>, transform_indices = @transform_7, window_bounds = array<i64: 1, 32>}, {pipeline_mode = #tpu.pipeline_mode<synchronous>, transform_indices = @transform_8, window_bounds = array<i64: 1, 1>}, {transform_indices = @transform_9, window_bounds = array<i64: 2, 16>}]} {
    %c0 = arith.constant 0 : index
    %c0_0 = arith.constant 0 : index
    %c0_1 = arith.constant 0 : index
    %0 = vector.load %arg1[%c0, %c0_0, %c0_1] : memref<2x16x32xf32, #tpu.memory_space<vmem>>, vector<2x16x32xf32>
    %1 = vector.shape_cast %0 : vector<2x16x32xf32> to vector<32x32xf32>
    %c0_2 = arith.constant 0 : index
    %c0_3 = arith.constant 0 : index
    %2 = vector.load %arg2[%c0_2, %c0_3] : memref<32x32xf32, #tpu.memory_space<vmem>>, vector<32x32xf32>
    %cst = arith.constant dense<0.000000e+00> : vector<32x32xf32>
    %3 = tpu.matmul %1, %2, %cst {dimension_numbers = #tpu.dot_dimension_numbers<[1], [0], [0], [1], [0, 0, 1, 1], [], []>} : vector<32x32xf32>, vector<32x32xf32>, vector<32x32xf32> -> vector<32x32xf32>
    %c0_4 = arith.constant 0 : index
    %c0_5 = arith.constant 0 : index
    %4 = vector.load %arg3[%c0_4, %c0_5] : memref<1x32xf32, #tpu.memory_space<vmem>>, vector<1x32xf32>
    %5 = vector.broadcast %4 : vector<1x32xf32> to vector<32x32xf32>
    %6 = arith.addf %3, %5 : vector<32x32xf32>
    %7 = math.tanh %6 : vector<32x32xf32>
    %c0_6 = arith.constant 0 : index
    %c0_7 = arith.constant 0 : index
    %8 = vector.load %arg4[%c0_6, %c0_7] : memref<32x32xf32, #tpu.memory_space<vmem>>, vector<32x32xf32>
    %cst_8 = arith.constant dense<0.000000e+00> : vector<32x32xf32>
    %9 = tpu.matmul %7, %8, %cst_8 {dimension_numbers = #tpu.dot_dimension_numbers<[1], [0], [0], [1], [0, 0, 1, 1], [], []>} : vector<32x32xf32>, vector<32x32xf32>, vector<32x32xf32> -> vector<32x32xf32>
    %c0_9 = arith.constant 0 : index
    %c0_10 = arith.constant 0 : index
    %10 = vector.load %arg5[%c0_9, %c0_10] : memref<32x32xf32, #tpu.memory_space<vmem>>, vector<32x32xf32>
    %cst_11 = arith.constant dense<0.000000e+00> : vector<32x32xf32>
    %11 = tpu.matmul %7, %10, %cst_11 {dimension_numbers = #tpu.dot_dimension_numbers<[1], [0], [0], [1], [0, 0, 1, 1], [], []>} : vector<32x32xf32>, vector<32x32xf32>, vector<32x32xf32> -> vector<32x32xf32>
    %c0_12 = arith.constant 0 : index
    %c0_13 = arith.constant 0 : index
    %12 = vector.load %arg6[%c0_12, %c0_13] : memref<32x32xf32, #tpu.memory_space<vmem>>, vector<32x32xf32>
    %cst_14 = arith.constant dense<0.000000e+00> : vector<32x32xf32>
    %13 = tpu.matmul %7, %12, %cst_14 {dimension_numbers = #tpu.dot_dimension_numbers<[1], [0], [0], [1], [0, 0, 1, 1], [], []>} : vector<32x32xf32>, vector<32x32xf32>, vector<32x32xf32> -> vector<32x32xf32>
    %14 = vector.shape_cast %9 : vector<32x32xf32> to vector<2x16x32xf32>
    %15 = vector.shape_cast %11 : vector<32x32xf32> to vector<2x16x32xf32>
    %16 = vector.shape_cast %13 : vector<32x32xf32> to vector<2x16x32xf32>
    "tpu.trace_start"() <{level = 10 : i32, message = "bsh,bth->bst"}> : () -> ()
    %cst_15 = arith.constant dense<0.000000e+00> : vector<2x16x16xf32>
    %17 = tpu.matmul %14, %15, %cst_15 {dimension_numbers = #tpu.dot_dimension_numbers<[2], [2], [1], [1], [0, 0, 0, 1, 1, 1], [0], [0]>} : vector<2x16x32xf32>, vector<2x16x32xf32>, vector<2x16x16xf32> -> vector<2x16x16xf32>
    %cst_16 = arith.constant 3.200000e+01 : f32
    "tpu.trace_stop"() : () -> ()
    %18 = math.sqrt %cst_16 : f32
    %cst_17 = arith.constant 1.000000e+00 : f32
    %19 = arith.divf %cst_17, %18 : f32
    %20 = vector.broadcast %19 : f32 to vector<2x16x16xf32>
    %21 = arith.mulf %17, %20 : vector<2x16x16xf32>
    %cst_18 = arith.constant dense<0xFF800000> : vector<2x16xf32>
    %22 = vector.multi_reduction <maximumf>, %21, %cst_18 [2] : vector<2x16x16xf32> to vector<2x16xf32>
    %23 = vector.shape_cast %22 : vector<2x16xf32> to vector<2x16x1xf32>
    %24 = vector.broadcast %23 : vector<2x16x1xf32> to vector<2x16x16xf32>
    %25 = arith.subf %21, %24 : vector<2x16x16xf32>
    %26 = math.exp %25 : vector<2x16x16xf32>
    %cst_19 = arith.constant dense<0.000000e+00> : vector<2x16xf32>
    %27 = vector.multi_reduction <add>, %26, %cst_19 [2] : vector<2x16x16xf32> to vector<2x16xf32>
    %28 = vector.shape_cast %27 : vector<2x16xf32> to vector<2x16x1xf32>
    %29 = tpu.reciprocal %28 {approx = true} : vector<2x16x1xf32> -> vector<2x16x1xf32>
    %30 = vector.broadcast %29 : vector<2x16x1xf32> to vector<2x16x16xf32>
    %31 = arith.mulf %26, %30 : vector<2x16x16xf32>
    "tpu.trace_start"() <{level = 10 : i32, message = "bst,bth->bsh"}> : () -> ()
    %cst_20 = arith.constant dense<0.000000e+00> : vector<2x16x32xf32>
    %32 = tpu.matmul %31, %16, %cst_20 {dimension_numbers = #tpu.dot_dimension_numbers<[2], [1], [1], [2], [0, 0, 0, 1, 1, 2], [0], [0]>} : vector<2x16x16xf32>, vector<2x16x32xf32>, vector<2x16x32xf32> -> vector<2x16x32xf32>
    "tpu.trace_stop"() : () -> ()
    %33 = math.tanh %32 : vector<2x16x32xf32>
    %34 = vector.shape_cast %7 : vector<32x32xf32> to vector<2x16x32xf32>
    %c0_21 = arith.constant 0 : index
    %c0_22 = arith.constant 0 : index
    %35 = vector.load %arg7[%c0_21, %c0_22] : memref<1x32xf32, #tpu.memory_space<vmem>>, vector<1x32xf32>
    %36 = vector.shape_cast %35 : vector<1x32xf32> to vector<1x1x32xf32>
    %c0_23 = arith.constant 0 : index
    %c0_24 = arith.constant 0 : index
    %37 = vector.load %arg8[%c0_23, %c0_24] : memref<1x32xf32, #tpu.memory_space<vmem>>, vector<1x32xf32>
    %38 = vector.shape_cast %37 : vector<1x32xf32> to vector<1x1x32xf32>
    %39 = vector.broadcast %36 : vector<1x1x32xf32> to vector<2x16x32xf32>
    %40 = arith.mulf %34, %39 : vector<2x16x32xf32>
    %41 = vector.broadcast %38 : vector<1x1x32xf32> to vector<2x16x32xf32>
    %42 = arith.mulf %33, %41 : vector<2x16x32xf32>
    %43 = arith.addf %40, %42 : vector<2x16x32xf32>
    %cst_25 = arith.constant dense<0.000000e+00> : vector<2x16xf32>
    %44 = vector.multi_reduction <add>, %43, %cst_25 [2] : vector<2x16x32xf32> to vector<2x16xf32>
    %c0_26 = arith.constant 0 : index
    %c0_27 = arith.constant 0 : index
    %45 = vector.load %arg9[%c0_26, %c0_27] : memref<1x1xf32, #tpu.memory_space<vmem>>, vector<1x1xf32>
    %46 = vector.broadcast %45 : vector<1x1xf32> to vector<2x16xf32>
    %47 = arith.addf %44, %46 : vector<2x16xf32>
    %c0_28 = arith.constant 0 : index
    %c0_29 = arith.constant 0 : index
    %48 = vector.load %arg10[%c0_28, %c0_29] : memref<2x16xf32, #tpu.memory_space<vmem>>, vector<2x16xf32>
    tpu.vector_store %arg10[%c0_28, %c0_29], %47 {strides = array<i32>} : memref<2x16xf32, #tpu.memory_space<vmem>>, vector<2x16xf32>,
    return
  }
  func.func @transform_0(%arg0: i32) -> (i32, i32, i32) {
    %c0_i32 = arith.constant 0 : i32
    %c0_i32_0 = arith.constant 0 : i32
    %c0_i32_1 = arith.constant 0 : i32
    return %arg0, %c0_i32, %c0_i32_0 : i32, i32, i32
  }
  func.func @transform_1(%arg0: i32) -> (i32, i32) {
    %c0_i32 = arith.constant 0 : i32
    %c0_i32_0 = arith.constant 0 : i32
    %c0_i32_1 = arith.constant 0 : i32
    return %c0_i32, %c0_i32_0 : i32, i32
  }
  func.func @transform_2(%arg0: i32) -> (i32, i32) {
    %c0_i32 = arith.constant 0 : i32
    %c0_i32_0 = arith.constant 0 : i32
    %c0_i32_1 = arith.constant 0 : i32
    return %c0_i32, %c0_i32_0 : i32, i32
  }
  func.func @transform_3(%arg0: i32) -> (i32, i32) {
    %c0_i32 = arith.constant 0 : i32
    %c0_i32_0 = arith.constant 0 : i32
    %c0_i32_1 = arith.constant 0 : i32
    return %c0_i32, %c0_i32_0 : i32, i32
  }
  func.func @transform_4(%arg0: i32) -> (i32, i32) {
    %c0_i32 = arith.constant 0 : i32
    %c0_i32_0 = arith.constant 0 : i32
    %c0_i32_1 = arith.constant 0 : i32
    return %c0_i32, %c0_i32_0 : i32, i32
  }
  func.func @transform_5(%arg0: i32) -> (i32, i32) {
    %c0_i32 = arith.constant 0 : i32
    %c0_i32_0 = arith.constant 0 : i32
    %c0_i32_1 = arith.constant 0 : i32
    return %c0_i32, %c0_i32_0 : i32, i32
  }
  func.func @transform_6(%arg0: i32) -> (i32, i32) {
    %c0_i32 = arith.constant 0 : i32
    %c0_i32_0 = arith.constant 0 : i32
    %c0_i32_1 = arith.constant 0 : i32
    return %c0_i32, %c0_i32_0 : i32, i32
  }
  func.func @transform_7(%arg0: i32) -> (i32, i32) {
    %c0_i32 = arith.constant 0 : i32
    %c0_i32_0 = arith.constant 0 : i32
    %c0_i32_1 = arith.constant 0 : i32
    return %c0_i32, %c0_i32_0 : i32, i32
  }
  func.func @transform_8(%arg0: i32) -> (i32, i32) {
    %c0_i32 = arith.constant 0 : i32
    %c0_i32_0 = arith.constant 0 : i32
    %c0_i32_1 = arith.constant 0 : i32
    return %c0_i32, %c0_i32_0 : i32, i32
  }
  func.func @transform_9(%arg0: i32) -> (i32, i32) {
    %c0_i32 = arith.constant 0 : i32
    %c0_i32_0 = arith.constant 0 : i32
    return %arg0, %c0_i32 : i32, i32
  }
}

</mosaic_0001>

<bundles_post_ra>
// kernel: tpu_custom_call.1
= control target key start
LH: loop header
LB: loop body
LE: loop exit
PB: predicated region body
PF: predicated region fallthrough
CT: control target
= control target key end

     0   :  { %s923_s0 = inlined_call_operand.hbm [shape: f32[2,16,32], index: 0, kind: input, shape index: {}]   ;;  %s924_s1 = inlined_call_operand.hbm [shape: f32[32,32], index: 1, kind: input, shape index: {}]   ;;  %s925_s2 = inlined_call_operand.vmem [shape: f32[1,32], index: 2, kind: input, shape index: {}]   ;;  %s926_s3 = inlined_call_operand.hbm [shape: f32[32,32], index: 3, kind: input, shape index: {}]   ;;  %s927_s4 = inlined_call_operand.hbm [shape: f32[32,32], index: 4, kind: input, shape index: {}]   ;;  %s928_s5 = inlined_call_operand.hbm [shape: f32[32,32], index: 5, kind: input, shape index: {}]   ;;  %s929_s6 = inlined_call_operand.vmem [shape: f32[1,32], index: 6, kind: input, shape index: {}]   ;;  %s930_s7 = inlined_call_operand.vmem [shape: f32[1,32], index: 7, kind: input, shape index: {}]   ;;  %s931_s8 = inlined_call_operand.<no memory space> [shape: f32[1,1], index: 8, kind: input, shape index: {}]   ;;  %s932_s9 = inlined_call_operand.hbm [shape: f32[2,16], index: 9, kind: output, shape index: {}]  }
   0x1   :  { %v14_v0 = vstv %s931_s8 }
   0x2   :  { %15 = vst [vmem:[#allocation2] sm:$0x1] %v14_v0 }
   0x3   :  { %16 = vsyncpa [#allocation4], 0 }
   0x4   :  { %17 = vsyncpa [#allocation7], 0 }
   0x5   :  { %18 = vsyncpa [#allocation10], 0 }
   0x6   :  { %19 = vsyncpa [#allocation5], 0  ;;  %s37_s13 = sshll.u32 %s924_s1, 4  ;;  %s770_s14 = smov [#allocation6]   ;;  %s38_s13 = int_to_ptr.hbm [resolvable:$true] %s37_s13 }
   0x7   :  { %s39_s15 = sshll.u32 %s770_s14, 4  ;;  %s65_s18 = sshll.u32 %s927_s4, 4  ;;  %s40_s15 = int_to_ptr.vmem [resolvable:$true] %s39_s15  ;;  %s66_s18 = int_to_ptr.hbm [resolvable:$true] %s65_s18 }
   0x8   :  { %s771_s19 = smov 128   ;;  %s772_s20 = smov 8  }
   0x9   :  { %45 = dma.hbm_to_vmem [thread:$0]  %s38_s13, 512, %s40_s15, [#allocation7], %s771_s19, %s771_s19, %s772_s20  }
   0xa   :  { %s773_s8 = smov [#allocation9]   ;;  %s24_s24 = sshll.u32 %s923_s0, 4  ;;  %s25_s24 = int_to_ptr.hbm [resolvable:$true] %s24_s24 }
   0xb   :  { %s67_s21 = sshll.u32 %s773_s8, 4  ;;  %s52_s26 = sshll.u32 %s926_s3, 4  ;;  %s68_s21 = int_to_ptr.vmem [resolvable:$true] %s67_s21  ;;  %s53_s26 = int_to_ptr.hbm [resolvable:$true] %s52_s26 }
   0xc   :  { %73 = dma.hbm_to_vmem [thread:$0]  %s66_s18, 512, %s68_s21, [#allocation10], %s771_s19, %s771_s19, %s772_s20  }
   0xd   :  { %s774_s27 = smov [#allocation3]   ;;  %s775_s4 = smov [#allocation8]  }
   0xe   :  { %s26_s28 = sshll.u32 %s774_s27, 4  ;;  %s54_s29 = sshll.u32 %s775_s4, 4  ;;  %s27_s28 = int_to_ptr.vmem [resolvable:$true] %s26_s28  ;;  %s55_s29 = int_to_ptr.vmem [resolvable:$true] %s54_s29 }
   0xf   :  { %32 = dma.hbm_to_vmem [thread:$0]  %s25_s24, 512, %s27_s28, [#allocation4], %s771_s19, %s771_s19, %s772_s20  }
  0x10   :  { %s78_s11 = sshll.u32 %s928_s5, 4  ;;  %s776_s0 = smov [#allocation11]   ;;  %s79_s11 = int_to_ptr.hbm [resolvable:$true] %s78_s11 }
  0x11   :  { %60 = dma.hbm_to_vmem [thread:$0]  %s53_s26, 512, %s55_s29, [#allocation7], %s771_s19, %s771_s19, %s772_s20  }
  0x12   :  { %s80_s12 = sshll.u32 %s776_s0, 4  ;;  %s81_s12 = int_to_ptr.vmem [resolvable:$true] %s80_s12 }
  0x13   :  { %86 = dma.hbm_to_vmem [thread:$0]  %s79_s11, 512, %s81_s12, [#allocation10], %s771_s19, %s771_s19, %s772_s20  }
  0x14   :  { %762 = dma.done.wait [#allocation4], 512  }
  0x15   :  { %763 = vsyncadd [#allocation4], 4294966784 }
  0x16   :  { %764 = dma.done.wait [#allocation7], 1024  }
  0x17   :  { %765 = vsyncadd [#allocation7], 4294966272 }
  0x18   :  { %766 = dma.done.wait [#allocation10], 1024  }
  0x19   :  { %767 = vsyncadd [#allocation10], 4294966272  ;;  %v120_v1 = vld [vmem:[#allocation6 + $0x18] sm:$0xff]  ;;  %v119_v2 = vld [vmem:[#allocation6 + $0x10] sm:$0xff]  ;;  %vm125_vm0 = vcmask 261120   ;;  %vm356_vm1 = vcmask 130048  }
  0x1a   :  { %150 = vmatpush.msra.mxu0 %v120_v1  ;;  %v118_v3 = vld [vmem:[#allocation6 + $0x8] sm:$0xff]  ;;  %v117_v4 = vld [vmem:[#allocation6] sm:$0xff]  ;;  %v115_v7 = vld [vmem:[#allocation3 + $0x10] sm:$0xff]  ;;  %vm515_vm2 = vcmask 130112   ;;  %vm520_vm3 = vcmask 1041409   ;;  %s532_s18 = sshll.u32 %s932_s9, 4  ;;  %s533_s18 = int_to_ptr.hbm [resolvable:$true] %s532_s18 }
  0x1b   :  { %v113_v5 = vld [vmem:[#allocation3] sm:$0xff]  ;;  %v114_v6 = vld [vmem:[#allocation3 + $0x8] sm:$0xff]  ;;  %v116_v8 = vld [vmem:[#allocation3 + $0x18] sm:$0xff]  ;;  %vm523_vm4 = vcmask 123904  }
  0x1c   :  { %151 = vmatpush.msra.mxu0 %v119_v2  ;;  %v174_v9 = vld [vmem:[#allocation8 + $0x18] sm:$0xff]  ;;  %v173_v12 = vld [vmem:[#allocation8 + $0x10] sm:$0xff]  ;;  %v172_v15 = vld [vmem:[#allocation8 + $0x8] sm:$0xff] }
  0x1d   :  { %v219_v10 = vld [vmem:[#allocation9 + $0x18] sm:$0xff]  ;;  %199 = vmatpush.msra.mxu1 %v174_v9  ;;  %v218_v13 = vld [vmem:[#allocation9 + $0x10] sm:$0xff]  ;;  %v217_v16 = vld [vmem:[#allocation9 + $0x8] sm:$0xff] }
  0x1e   :  { %152 = vmatpush.msra.mxu0 %v118_v3  ;;  %v252_v11 = vld [vmem:[#allocation11 + $0x18] sm:$0xff]  ;;  %232 = vmatpush.msra.mxu2 %v219_v10  ;;  %v251_v14 = vld [vmem:[#allocation11 + $0x10] sm:$0xff]  ;;  %v250_v17 = vld [vmem:[#allocation11 + $0x8] sm:$0xff] }
  0x1f   :  { %265 = vmatpush.msra.mxu3 %v252_v11  ;;  %200 = vmatpush.msra.mxu1 %v173_v12  ;;  %v171_v18 = vld [vmem:[#allocation8] sm:$0xff]  ;;  %v582_v21 = vld [vmem:[%s925_s2] ss:$0 sm:$0xff] }
  0x20   :  { %153 = vmatpush.msra.mxu0 %v117_v4  ;;  %233 = vmatpush.msra.mxu2 %v218_v13  ;;  %v216_v19 = vld [vmem:[#allocation9] sm:$0xff] }
  0x21   :  { %544 = vmatmul.msk.f32.vlgmr.msra.gmra.mxu0 %vm125_vm0, %v113_v5  ;;  %266 = vmatpush.msra.mxu3 %v251_v14  ;;  %v249_v20 = vld [vmem:[#allocation11] sm:$0xff] }
  0x22   :  { %201 = vmatpush.msra.mxu1 %v172_v15  ;;  %234 = vmatpush.msra.mxu2 %v217_v16 }
  0x23   :  { %267 = vmatpush.msra.mxu3 %v250_v17 }
  0x24   :  { %202 = vmatpush.msra.mxu1 %v171_v18  ;;  %235 = vmatpush.msra.mxu2 %v216_v19 }
  0x25   :  { %268 = vmatpush.msra.mxu3 %v249_v20 }
  0x29   :  { %545 = vmatmul.msk.f32.gmra.mxu0 %vm125_vm0, %v114_v6 }
  0x31   :  { %546 = vmatmul.msk.f32.gmra.mxu0 %vm125_vm0, %v115_v7 }
  0x39   :  { %547 = vmatmul.msk.f32.gmra.mxu0 %vm125_vm0, %v116_v8 }
  0x9e   :  { %v155_v22 = vpop.f32.mrf.mxu0 }
  0x9f   :  { %v156_v23 = vadd.f32 %v582_v21, %v155_v22 }
  0xa1   :  { %586 = vtanh.f32 %v156_v23 }
  0xa6   :  { %v158_v24 = vpop.f32.mrf.mxu0 }
  0xa7   :  { %v854_v25 = vpop.eup %586  ;;  %v159_v26 = vadd.f32 %v582_v21, %v158_v24 }
  0xa8   :  { %548 = vmatmul.msk.f32.vlgmr.msra.gmra.mxu1 %vm125_vm0, %v854_v25  ;;  %552 = vmatmul.msk.f32.vlgmr.msra.gmra.mxu2 %vm125_vm0, %v854_v25 }
  0xa9   :  { %588 = vtanh.f32 %v159_v26  ;;  %556 = vmatmul.msk.f32.vlgmr.msra.gmra.mxu3 %vm125_vm0, %v854_v25 }
  0xae   :  { %v161_v27 = vpop.f32.mrf.mxu0 }
  0xaf   :  { %v862_v28 = vpop.eup %588  ;;  %v162_v29 = vadd.f32 %v582_v21, %v161_v27 }
  0xb0   :  { %549 = vmatmul.msk.f32.gmra.mxu1 %vm125_vm0, %v862_v28  ;;  %553 = vmatmul.msk.f32.gmra.mxu2 %vm125_vm0, %v862_v28 }
  0xb1   :  { %590 = vtanh.f32 %v162_v29  ;;  %557 = vmatmul.msk.f32.gmra.mxu3 %vm125_vm0, %v862_v28  ;;  %v583_v29 = vld [vmem:[%s929_s6] ss:$0 sm:$0xff]  ;;  %s778_s6 = smov [#allocation12]  }
  0xb6   :  { %v164_v30 = vpop.f32.mrf.mxu0 }
  0xb7   :  { %v870_v31 = vpop.eup %590  ;;  %v165_v32 = vadd.f32 %v582_v21, %v164_v30  ;;  %v584_v30 = vld [vmem:[%s930_s7] ss:$0 sm:$0xff]  ;;  %s530_s7 = sshll.u32 %s778_s6, 4  ;;  %s531_s7 = int_to_ptr.vmem [resolvable:$true] %s530_s7 }
  0xb8   :  { %554 = vmatmul.msk.f32.gmra.mxu2 %vm125_vm0, %v870_v31  ;;  %550 = vmatmul.msk.f32.gmra.mxu1 %vm125_vm0, %v870_v31 }
  0xb9   :  { %592 = vtanh.f32 %v165_v32  ;;  %558 = vmatmul.msk.f32.gmra.mxu3 %vm125_vm0, %v870_v31  ;;  %v777_v32 = vmov 0  }
  0xba   :  { %581 = vset.pattern.permute.xlu0 %v777_v32 }
  0xbf   :  { %v878_v33 = vpop.eup %592 }
  0xc0   :  { %555 = vmatmul.msk.f32.gmra.mxu2 %vm125_vm0, %v878_v33  ;;  %551 = vmatmul.msk.f32.gmra.mxu1 %vm125_vm0, %v878_v33 }
  0xc1   :  { %559 = vmatmul.msk.f32.gmra.mxu3 %vm125_vm0, %v878_v33 }
 0x125   :  { %v204_v38 = vpop.f32.mrf.mxu1 }
 0x12b   :  { %v237_v34 = vpop.f32.mrf.mxu2 }
 0x12c   :  { %v270_v35 = vpop.f32.mrf.mxu3 }
 0x12d   :  { %v207_v41 = vpop.f32.mrf.mxu1 }
 0x133   :  { %v240_v36 = vpop.f32.mrf.mxu2 }
 0x134   :  { %v273_v37 = vpop.f32.mrf.mxu3  ;;  %560 = vmatpush.xpose.msk.msrb.mxu0 %vm125_vm0, %v240_v36  ;;  %v468_v36 = vmul.f32 %v854_v25, %v583_v29  ;;  %v470_v25 = vmul.f32 %v870_v31, %v583_v29 }
 0x135   :  { %421 = vmatpush.msrb.mxu2 %v273_v37  ;;  %v210_v44 = vpop.f32.mrf.mxu1 }
 0x137   :  { %422 = vmatpush.msrb.mxu2 %v270_v35 }
 0x138   :  { %561 = vmatpush.xpose.msk.msrb.mxu0 %vm125_vm0, %v237_v34 }
 0x13b   :  { %v243_v39 = vpop.f32.mrf.mxu2  ;;  %562 = vmatmul.msk.f32.vlgmr.msrb.gmra.mxu0 %vm125_vm0, %v204_v38 }
 0x13c   :  { %v276_v40 = vpop.f32.mrf.mxu3 }
 0x13d   :  { %v213_v45 = vpop.f32.mrf.mxu1 }
 0x143   :  { %v246_v42 = vpop.f32.mrf.mxu2  ;;  %563 = vmatmul.msk.f32.gmra.mxu0 %vm125_vm0, %v207_v41 }
 0x144   :  { %v279_v43 = vpop.f32.mrf.mxu3  ;;  %564 = vmatpush.xpose.msk.msrb.mxu1 %vm125_vm0, %v246_v42  ;;  %v469_v42 = vmul.f32 %v862_v28, %v583_v29 }
 0x145   :  { %450 = vmatpush.msrb.mxu3 %v279_v43 }
 0x147   :  { %451 = vmatpush.msrb.mxu3 %v276_v40 }
 0x148   :  { %565 = vmatpush.xpose.msk.msrb.mxu1 %vm125_vm0, %v243_v39 }
 0x14b   :  { %566 = vmatmul.msk.f32.vlgmr.msrb.gmra.mxu1 %vm125_vm0, %v210_v44 }
 0x153   :  { %567 = vmatmul.msk.f32.gmra.mxu1 %vm125_vm0, %v213_v45 }
 0x1b8   :  { %v311_v46 = vpop.f32.mrf.mxu0 }
 0x1b9   :  { %v352_v47 = vmul.f32 0.17677669, %v311_v46 }
 0x1bb   :  { %v357_v48 = vsel %vm356_vm1, %v352_v47, -inf }
 0x1bc   :  { %358 = vmax.xlane.f32.xlu0 %v357_v48 }
 0x1c0   :  { %v314_v49 = vpop.f32.mrf.mxu0 }
 0x1c1   :  { %v353_v50 = vmul.f32 0.17677669, %v314_v49 }
 0x1c3   :  { %v360_v51 = vsel %vm356_vm1, %v353_v50, -inf }
 0x1c4   :  { %361 = vmax.xlane.f32.xlu1 %v360_v51 }
 0x1c8   :  { %v346_v52 = vpop.f32.mrf.mxu1 }
 0x1c9   :  { %v354_v53 = vmul.f32 0.17677669, %v346_v52  ;;  %v471_v52 = vmul.f32 %v878_v33, %v583_v29 }
 0x1cb   :  { %v363_v54 = vsel %vm356_vm1, %v354_v53, -inf }
 0x1cc   :  { %364 = vmax.xlane.f32.xlu0 %v363_v54 }
 0x1d0   :  { %v349_v55 = vpop.f32.mrf.mxu1 }
 0x1d1   :  { %v355_v56 = vmul.f32 0.17677669, %v349_v55  ;;  %v585_v55 = vld [vmem:[#allocation2] ss:$0 sm:$0xff] }
 0x1d3   :  { %v366_v57 = vsel %vm356_vm1, %v355_v56, -inf }
 0x1d4   :  { %367 = vmax.xlane.f32.xlu1 %v366_v57 }
 0x22f   :  { %v359_v58 = vpop.xlane.xlu0 %358 }
 0x230   :  { %v369_v59 = vsub.f32 %v352_v47, %v359_v58 }
 0x232   :  { %v373_v60 = vmul.f32 1.442695, %v369_v59 }
 0x234   :  { %594 = vpow2.f32 %v373_v60 }
 0x237   :  { %v362_v61 = vpop.xlane.xlu1 %361 }
 0x238   :  { %v370_v62 = vsub.f32 %v353_v50, %v362_v61 }
 0x23a   :  { %v595_v63 = vpop.eup %594  ;;  %v375_v0 = vmul.f32 1.442695, %v370_v62 }
 0x23b   :  { %v381_v1 = vsel %vm356_vm1, %v595_v63, 0.0 }
 0x23c   :  { %596 = vpow2.f32 %v375_v0  ;;  %382 = vadd.xlane.f32.xlu2 %v381_v1 }
 0x23f   :  { %v365_v2 = vpop.xlane.xlu0 %364 }
 0x240   :  { %v371_v3 = vsub.f32 %v354_v53, %v365_v2 }
 0x242   :  { %v597_v4 = vpop.eup %596  ;;  %v377_v5 = vmul.f32 1.442695, %v371_v3 }
 0x243   :  { %v384_v6 = vsel %vm356_vm1, %v597_v4, 0.0 }
 0x244   :  { %598 = vpow2.f32 %v377_v5  ;;  %385 = vadd.xlane.f32.xlu0 %v384_v6 }
 0x247   :  { %v368_v7 = vpop.xlane.xlu1 %367 }
 0x248   :  { %v372_v8 = vsub.f32 %v355_v56, %v368_v7  ;;  %v510_v56 = vlaneseq }
 0x24a   :  { %v599_v9 = vpop.eup %598  ;;  %v379_v10 = vmul.f32 1.442695, %v372_v8  ;;  %v511_v31 = vand.u32 127, %v510_v56 }
 0x24b   :  { %v387_v11 = vsel %vm356_vm1, %v599_v9, 0.0 }
 0x24c   :  { %600 = vpow2.f32 %v379_v10  ;;  %388 = vadd.xlane.f32.xlu2 %v387_v11  ;;  %v513_v60 = vadd.s32 4294967288, %v511_v31 }
 0x252   :  { %v601_v12 = vpop.eup %600 }
 0x253   :  { %v390_v13 = vsel %vm356_vm1, %v601_v12, 0.0 }
 0x254   :  { %391 = vadd.xlane.f32.xlu1 %v390_v13 }
 0x2af   :  { %v383_v14 = vpop.xlane.xlu2 %382 }
 0x2b0   :  { %602 = vrcp.f32 %v383_v14 }
 0x2b6   :  { %v603_v15 = vpop.eup %602 }
 0x2b7   :  { %v386_v16 = vpop.xlane.xlu0 %385  ;;  %v397_v17 = vmul.f32 %v603_v15, %v595_v63 }
 0x2b8   :  { %604 = vrcp.f32 %v386_v16 }
 0x2b9   :  { %568 = vmatmul.msk.f32.vlgmr.msrb.gmra.mxu2 %vm356_vm1, %v397_v17 }
 0x2be   :  { %v605_v18 = vpop.eup %604 }
 0x2bf   :  { %v389_v19 = vpop.xlane.xlu2 %388  ;;  %v398_v20 = vmul.f32 %v605_v18, %v597_v4 }
 0x2c0   :  { %606 = vrcp.f32 %v389_v19 }
 0x2c1   :  { %569 = vmatmul.msk.f32.gmra.mxu2 %vm356_vm1, %v398_v20 }
 0x2c6   :  { %v607_v21 = vpop.eup %606 }
 0x2c7   :  { %v392_v22 = vpop.xlane.xlu1 %391  ;;  %v399_v23 = vmul.f32 %v607_v21, %v599_v9 }
 0x2c8   :  { %608 = vrcp.f32 %v392_v22 }
 0x2c9   :  { %570 = vmatmul.msk.f32.vlgmr.msrb.gmra.mxu3 %vm356_vm1, %v399_v23 }
 0x2ce   :  { %v609_v24 = vpop.eup %608 }
 0x2cf   :  { %v400_v26 = vmul.f32 %v609_v24, %v601_v12 }
 0x2d1   :  { %571 = vmatmul.msk.f32.gmra.mxu3 %vm356_vm1, %v400_v26 }
 0x33c   :  { %v424_v27 = vpop.f32.mrf.mxu2 }
 0x33d   :  { %610 = vtanh.f32 %v424_v27 }
 0x343   :  { %v611_v34 = vpop.eup %610 }
 0x344   :  { %v427_v35 = vpop.f32.mrf.mxu2  ;;  %v475_v37 = vmul.f32 %v611_v34, %v584_v30 }
 0x345   :  { %612 = vtanh.f32 %v427_v35 }
 0x346   :  { %v479_v38 = vadd.f32 %v475_v37, %v468_v36 }
 0x348   :  { %v483_v39 = vsel %vm125_vm0, %v479_v38, 0.0 }
 0x349   :  { %484 = vadd.xlane.f32.xlu2 %v483_v39 }
 0x34b   :  { %v613_v40 = vpop.eup %612 }
 0x34c   :  { %v453_v41 = vpop.f32.mrf.mxu3  ;;  %v476_v43 = vmul.f32 %v613_v40, %v584_v30 }
 0x34d   :  { %614 = vtanh.f32 %v453_v41 }
 0x34e   :  { %v480_v44 = vadd.f32 %v476_v43, %v469_v42 }
 0x350   :  { %v486_v45 = vsel %vm125_vm0, %v480_v44, 0.0 }
 0x351   :  { %487 = vadd.xlane.f32.xlu0 %v486_v45 }
 0x353   :  { %v615_v46 = vpop.eup %614 }
 0x354   :  { %v456_v47 = vpop.f32.mrf.mxu3  ;;  %v477_v48 = vmul.f32 %v615_v46, %v584_v30 }
 0x355   :  { %616 = vtanh.f32 %v456_v47 }
 0x356   :  { %v481_v49 = vadd.f32 %v477_v48, %v470_v25 }
 0x358   :  { %v489_v50 = vsel %vm125_vm0, %v481_v49, 0.0 }
 0x359   :  { %490 = vadd.xlane.f32.xlu1 %v489_v50 }
 0x35b   :  { %v617_v51 = vpop.eup %616 }
 0x35c   :  { %v478_v28 = vmul.f32 %v617_v51, %v584_v30 }
 0x35e   :  { %v482_v53 = vadd.f32 %v478_v28, %v471_v52 }
 0x360   :  { %v492_v54 = vsel %vm125_vm0, %v482_v53, 0.0 }
 0x361   :  { %493 = vadd.xlane.f32.xlu2 %v492_v54 }
 0x365   :  { %499 = vperm.xlu0 %581, %v585_v55  }
 0x3bc   :  { %v485_v57 = vpop.xlane.xlu2 %484 }
 0x3c4   :  { %v488_v58 = vpop.xlane.xlu0 %487 }
 0x3cc   :  { %v491_v59 = vpop.xlane.xlu1 %490 }
 0x3d4   :  { %v494_v61 = vpop.xlane.xlu2 %493 }
 0x3d7   :  { %v500_v62 = vpop.permute.xlu0 %499 }
 0x3d8   :  { %v502_v63 = vadd.f32 %v500_v62, %v485_v57  ;;  %v503_v0 = vadd.f32 %v500_v62, %v488_v58  ;;  %v504_v1 = vadd.f32 %v500_v62, %v491_v59  ;;  %v505_v2 = vadd.f32 %v500_v62, %v494_v61 }
 0x3da   :  { %v512_v33 = vperm.slane %v502_v63, %v511_v31  ;;  %v514_v3 = vperm.slane %v503_v0, %v513_v60  ;;  %v517_v4 = vperm.slane %v504_v1, %v511_v31  ;;  %v518_v5 = vperm.slane %v505_v2, %v513_v60 }
 0x3dc   :  { %v516_v6 = vsel %vm515_vm2, %v514_v3, %v512_v33  ;;  %v519_v7 = vsel %vm515_vm2, %v518_v5, %v517_v4 }
 0x3dd   :  { %v521_v8 = vsel %vm520_vm3, %v519_v7, %v516_v6 }
 0x3de   :  { %524 = vst.msk [vmem:[#allocation12] sm:$0x3] %vm523_vm4, %v521_v8 }
 0x3df   :  { %535 = dma.vmem_to_hbm [thread:$0]  %s531_s7, 32, %s533_s18, [#allocation5]  }
 0x3e0   :  { %768 = dma.done.wait [#allocation5], 32  }
 0x3e1   :  { %769 = vsyncadd [#allocation5], 4294967264 }
 0x3e2   :  { %540 = vsyncpa [#allocation4], 1 }
 0x3e3   :  { %541 = vsyncpa [#allocation7], 1 }
 0x3e4   :  { %542 = vsyncpa [#allocation10], 1 }
 0x3e5   :  { %543 = vsyncpa [#allocation5], 1 }

</bundles_post_ra>
